<compile_context>
chip_gen: v7x
topology: tpu7x:2x2x1
jax: 0.10.0
libtpu: 0.0.40
codegen_flags: <defaults>
</compile_context>

<pallas_src>
import functools

import jax
import jax.numpy as jnp
from jax.experimental import pallas as pl
from jax.experimental.pallas import tpu as pltpu


def _round_up(x, m):
    return ((x + m - 1) // m) * m


def _gelu_exact(h):
    """Exact erf GELU (matches PyTorch nn.GELU default).

    erf is evaluated on the EUP in f32 (free slot); the surrounding multiplies
    stay in h's dtype (bf16 on v6e/v7x, f32 on v5e).
    """
    erf = jax.lax.erf(h.astype(jnp.float32) * 0.7071067811865476)
    return (h * 0.5) * (erf + 1.0).astype(h.dtype)


def _generator_kernel(x_ref, pos_ref, w_in_ref, w_pos_ref, w_out_ref, b_out_ref,
                      out_ref, *, compute_dtype):
    # Channel-major activations: (channels, tile_pixels), pixels on lanes.
    # Both projections (image+mask channels, pos+ones bias row) run on the MXU
    # with f32 accumulation; only GELU / tanh touch the VPU/EUP.
    h = jnp.dot(w_in_ref[...], x_ref[...], preferred_element_type=jnp.float32)
    h = h + jnp.dot(w_pos_ref[...], pos_ref[...], preferred_element_type=jnp.float32)
    h = _gelu_exact(h.astype(compute_dtype))                      # (hidden, TP)
    y = jnp.dot(w_out_ref[...], h, preferred_element_type=jnp.float32)
    y = y + b_out_ref[...]                                        # (c_out, 1) lane-broadcast
    out_ref[...] = jnp.tanh(y).astype(out_ref.dtype)              # lane-dense store


def set_position(pos, batch_size):
    """Mirror of ImagineModel.set_position (kept for interface fidelity).

    pos: (C_pos, H, W) -> pixel_pos: (H*W, B, C_pos).  The kernel wrapper
    consumes the deduplicated (C_pos, H, W) grid directly, since pixel_pos is
    just this grid broadcast over batch.
    """
    b = batch_size
    pp = jnp.broadcast_to(pos[None], (b,) + pos.shape)            # (B, Cpos, H, W)
    pp = pp.reshape(b, pos.shape[0], -1)                          # (B, Cpos, HW)
    pp = jnp.transpose(pp, (2, 0, 1))                             # (HW, B, Cpos)
    return pp


def init_params(key, c_img=3, c_pos=8, hidden=32, c_out=3):
    """Channel-major weights: columns are input channels, rows are outputs."""
    ks = jax.random.split(key, 4)
    s = 0.1
    return {
        "w_img": s * jax.random.normal(ks[0], (hidden, c_img), jnp.float32),
        "w_msk": s * jax.random.normal(ks[1], (hidden, 1), jnp.float32),
        "w_pos": s * jax.random.normal(ks[2], (hidden, c_pos), jnp.float32),
        "b_in":  jnp.zeros((hidden, 1), jnp.float32),
        "w_out": s * jax.random.normal(ks[3], (c_out, hidden), jnp.float32),
        "b_out": jnp.zeros((c_out, 1), jnp.float32),
    }


def _device_kind():
    try:
        return jax.devices()[0].device_kind.lower()
    except Exception:
        return ""


def auto_compute_dtype():
    kind = _device_kind()
    if "v6" in kind or "v7" in kind:
        return jnp.bfloat16      # bf16 VPU/EUP: run the elementwise chain in bf16
    return jnp.float32           # v5e and older: no bf16 VPU/EUP


def _chip_tuning():
    """(target tile_pixels, vmem_limit_bytes) per chip generation."""
    kind = _device_kind()
    if "v7" in kind:                       # 64 MiB physical VMEM per TensorCore
        return 16384, 48 << 20
    if "v5" in kind or "v6" in kind:       # 128 MiB physical VMEM
        return 32768, 96 << 20
    return 16384, 64 << 20                 # unknown chip: conservative


def _pick_tile(HW, B, target_tile):
    hw128 = _round_up(HW, 128)
    tile = min(target_tile, hw128)
    num_tiles = (hw128 + tile - 1) // tile
    # keep >= 2 total grid steps so both v7x TensorCores get work
    if B * num_tiles < 2 and hw128 >= 256:
        num_tiles = 2
    # even split of the 128-padded pixel range -> minimal padding waste
    return _round_up((hw128 + num_tiles - 1) // num_tiles, 128)


def _prepare_operands(params, pdata, half_fmask, pos, compute_dtype):
    """Shared host-side folding/casting used by the Pallas path AND the pure-JAX
    reference (so the self-test compares identical math)."""
    B, c_img, H, W = pdata.shape
    HW = H * W
    c_pos = params["w_pos"].shape[1]
    io_dtype = jnp.bfloat16      # HBM storage dtype for activation streams

    # Channel concat exactly as the module does, but with the (1 - mask)
    # inversion folded into the weights:
    #   W @ [pdata; 1-m] = [W_img, -W_msk] @ [pdata; m] + W_msk.
    x = jnp.concatenate([pdata.reshape(B, c_img, HW),
                         half_fmask.reshape(B, 1, HW)], axis=1).astype(io_dtype)
    # ones-row appended to pos folds b_in (and the +W_msk term) into the pos matmul.
    pos_aug = jnp.concatenate([pos.reshape(c_pos, HW),
                               jnp.ones((1, HW), pos.dtype)], axis=0).astype(io_dtype)

    b_in_eff = params["b_in"] + params["w_msk"]                   # (hidden, 1)
    w_in = jnp.concatenate([params["w_img"], -params["w_msk"]], axis=1).astype(io_dtype)
    w_pos_aug = jnp.concatenate([params["w_pos"], b_in_eff], axis=1).astype(io_dtype)
    w_out = params["w_out"].astype(compute_dtype)
    b_out = params["b_out"].astype(jnp.float32)
    return x, pos_aug, w_in, w_pos_aug, w_out, b_out


def imagine_forward(params, pdata, half_fmask, pos, *, compute_dtype=None,
                    tile_pixels=None):
    """pdata: (B, 3, H, W) NCHW, half_fmask: (B, 1, H, W), pos: (C_pos, H, W)."""
    if compute_dtype is None:
        compute_dtype = auto_compute_dtype()
    target_tile, vmem_limit = _chip_tuning()

    B, c_img, H, W = pdata.shape
    HW = H * W
    c_pos = params["w_pos"].shape[1]
    c_out = params["w_out"].shape[0]

    x, pos_aug, w_in, w_pos_aug, w_out, b_out = _prepare_operands(
        params, pdata, half_fmask, pos, compute_dtype)

    tile = tile_pixels if tile_pixels is not None else _pick_tile(HW, B, target_tile)
    HW_pad = _round_up(HW, tile)
    if HW_pad != HW:
        x = jnp.pad(x, ((0, 0), (0, 0), (0, HW_pad - HW)))
        pos_aug = jnp.pad(pos_aug, ((0, 0), (0, HW_pad - HW)))
    num_tiles = HW_pad // tile

    vmem_whole = pl.BlockSpec(memory_space=pltpu.MemorySpace.VMEM)
    kernel = functools.partial(_generator_kernel, compute_dtype=compute_dtype)

    out_f = pl.pallas_call(
        kernel,
        out_shape=jax.ShapeDtypeStruct((B, c_out, HW_pad), jnp.float32),
        grid_spec=pltpu.PrefetchScalarGridSpec(
            num_scalar_prefetch=0,
            # pixel axis outer, batch inner: pos tile is reused across batch.
            grid=(num_tiles, B),
            in_specs=[
                pl.BlockSpec((None, c_img + 1, tile), lambda p, b: (b, 0, p)),
                pl.BlockSpec((c_pos + 1, tile),       lambda p, b: (0, p)),
                vmem_whole,   # w_in      (hidden, 4)        bf16
                vmem_whole,   # w_pos_aug (hidden, c_pos+1)  bf16
                vmem_whole,   # w_out     (c_out, hidden)    compute dtype
                vmem_whole,   # b_out     (c_out, 1)         f32
            ],
            out_specs=pl.BlockSpec((None, c_out, tile), lambda p, b: (b, 0, p)),
        ),
        compiler_params=pltpu.CompilerParams(
            dimension_semantics=("parallel", "parallel"),
            vmem_limit_bytes=vmem_limit),
    )(x, pos_aug, w_in, w_pos_aug, w_out, b_out)

    return out_f[:, :, :HW].reshape(B, c_out, H, W)


def imagine_forward_ref(params, pdata, half_fmask, pos, *, compute_dtype=jnp.float32):
    """Pure-JAX reference of the same surrogate forward (for validation)."""
    B, c_img, H, W = pdata.shape
    x, pos_aug, w_in, w_pos_aug, w_out, b_out = _prepare_operands(
        params, pdata, half_fmask, pos, compute_dtype)
    h = jnp.einsum("hc,bcn->bhn", w_in, x, preferred_element_type=jnp.float32)
    h = h + jnp.einsum("hc,cn->hn", w_pos_aug, pos_aug,
                       preferred_element_type=jnp.float32)[None]
    h = _gelu_exact(h.astype(compute_dtype))
    y = jnp.einsum("oh,bhn->bon", w_out, h, preferred_element_type=jnp.float32) + b_out
    return jnp.tanh(y).reshape(B, -1, H, W).astype(jnp.float32)


if __name__ == "__main__":
    key = jax.random.PRNGKey(0)
    k_p, k_d, k_m, k_pos = jax.random.split(key, 4)

    B, H, W = 2, 16, 16
    C_POS, HIDDEN = 8, 32

    params = init_params(k_p, c_img=3, c_pos=C_POS, hidden=HIDDEN)

    pdata = jax.random.normal(k_d, (B, 3, H, W), jnp.float32)               # NCHW image
    half_fmask = (jax.random.uniform(k_m, (B, 1, H, W)) > 0.5).astype(jnp.float32)
    pos = jax.random.normal(k_pos, (C_POS, H, W), jnp.float32)              # positional grid

    cd = auto_compute_dtype()
    out = imagine_forward(params, pdata, half_fmask, pos, compute_dtype=cd)
    out = jax.block_until_ready(out)

    ref = imagine_forward_ref(params, pdata, half_fmask, pos, compute_dtype=cd)
    assert out.shape == (B, 3, H, W)
    tol = 1e-3 if cd == jnp.float32 else 3e-2
    assert jnp.allclose(out, ref, atol=tol, rtol=tol), \
        float(jnp.max(jnp.abs(out - ref)))

    print("KERNEL_OK")
</pallas_src>

<mosaic_0001>
module attributes {stable_mosaic.version = 11 : i64} {
  func.func @_generator_kernel(%arg0: i32, %arg1: i32, %arg2: memref<1x4x256xbf16, #tpu.memory_space<vmem>>, %arg3: memref<9x256xbf16, #tpu.memory_space<vmem>>, %arg4: memref<32x4xbf16, #tpu.memory_space<vmem>>, %arg5: memref<32x9xbf16, #tpu.memory_space<vmem>>, %arg6: memref<3x32xf32, #tpu.memory_space<vmem>>, %arg7: memref<3x1xf32, #tpu.memory_space<vmem>>, %arg8: memref<1x3x256xf32, #tpu.memory_space<vmem>>) attributes {dimension_semantics = [#tpu.dimension_semantics<parallel>, #tpu.dimension_semantics<parallel>], iteration_bounds = array<i64: 1, 2>, scalar_prefetch = 0 : i64, scratch_operands = 0 : i64, tpu.core_type = #tpu.core_type<tc>, window_params = [{transform_indices = @transform_0, window_bounds = array<i64: 1, 4, 256>}, {transform_indices = @transform_1, window_bounds = array<i64: 9, 256>}, {pipeline_mode = #tpu.pipeline_mode<synchronous>, transform_indices = @transform_2, window_bounds = array<i64: 32, 4>}, {pipeline_mode = #tpu.pipeline_mode<synchronous>, transform_indices = @transform_3, window_bounds = array<i64: 32, 9>}, {pipeline_mode = #tpu.pipeline_mode<synchronous>, transform_indices = @transform_4, window_bounds = array<i64: 3, 32>}, {pipeline_mode = #tpu.pipeline_mode<synchronous>, transform_indices = @transform_5, window_bounds = array<i64: 3, 1>}, {transform_indices = @transform_6, window_bounds = array<i64: 1, 3, 256>}]} {
    %c0 = arith.constant 0 : index
    %c0_0 = arith.constant 0 : index
    %0 = vector.load %arg4[%c0, %c0_0] : memref<32x4xbf16, #tpu.memory_space<vmem>>, vector<32x4xbf16>
    %c0_1 = arith.constant 0 : index
    %c0_2 = arith.constant 0 : index
    %c0_3 = arith.constant 0 : index
    %1 = vector.load %arg2[%c0_1, %c0_2, %c0_3] : memref<1x4x256xbf16, #tpu.memory_space<vmem>>, vector<1x4x256xbf16>
    %2 = vector.shape_cast %1 : vector<1x4x256xbf16> to vector<4x256xbf16>
    %cst = arith.constant dense<0.000000e+00> : vector<32x256xf32>
    %3 = tpu.matmul %0, %2, %cst {dimension_numbers = #tpu.dot_dimension_numbers<[1], [0], [0], [1], [0, 0, 1, 1], [], []>} : vector<32x4xbf16>, vector<4x256xbf16>, vector<32x256xf32> -> vector<32x256xf32>
    %c0_4 = arith.constant 0 : index
    %c0_5 = arith.constant 0 : index
    %4 = vector.load %arg5[%c0_4, %c0_5] : memref<32x9xbf16, #tpu.memory_space<vmem>>, vector<32x9xbf16>
    %c0_6 = arith.constant 0 : index
    %c0_7 = arith.constant 0 : index
    %5 = vector.load %arg3[%c0_6, %c0_7] : memref<9x256xbf16, #tpu.memory_space<vmem>>, vector<9x256xbf16>
    %cst_8 = arith.constant dense<0.000000e+00> : vector<32x256xf32>
    %6 = tpu.matmul %4, %5, %cst_8 {dimension_numbers = #tpu.dot_dimension_numbers<[1], [0], [0], [1], [0, 0, 1, 1], [], []>} : vector<32x9xbf16>, vector<9x256xbf16>, vector<32x256xf32> -> vector<32x256xf32>
    %7 = arith.addf %3, %6 : vector<32x256xf32>
    %cst_9 = arith.constant 0.707106769 : f32
    %8 = vector.broadcast %cst_9 : f32 to vector<32x256xf32>
    %9 = arith.mulf %7, %8 : vector<32x256xf32>
    %10 = math.erf %9 : vector<32x256xf32>
    %cst_10 = arith.constant 5.000000e-01 : f32
    %11 = vector.broadcast %cst_10 : f32 to vector<32x256xf32>
    %12 = arith.mulf %7, %11 : vector<32x256xf32>
    %cst_11 = arith.constant 1.000000e+00 : f32
    %13 = vector.broadcast %cst_11 : f32 to vector<32x256xf32>
    %14 = arith.addf %10, %13 : vector<32x256xf32>
    %15 = arith.mulf %12, %14 : vector<32x256xf32>
    %c0_12 = arith.constant 0 : index
    %c0_13 = arith.constant 0 : index
    %16 = vector.load %arg6[%c0_12, %c0_13] : memref<3x32xf32, #tpu.memory_space<vmem>>, vector<3x32xf32>
    %cst_14 = arith.constant dense<0.000000e+00> : vector<3x256xf32>
    %17 = tpu.matmul %16, %15, %cst_14 {dimension_numbers = #tpu.dot_dimension_numbers<[1], [0], [0], [1], [0, 0, 1, 1], [], []>} : vector<3x32xf32>, vector<32x256xf32>, vector<3x256xf32> -> vector<3x256xf32>
    %c0_15 = arith.constant 0 : index
    %c0_16 = arith.constant 0 : index
    %18 = vector.load %arg7[%c0_15, %c0_16] : memref<3x1xf32, #tpu.memory_space<vmem>>, vector<3x1xf32>
    %19 = vector.broadcast %18 : vector<3x1xf32> to vector<3x256xf32>
    %20 = arith.addf %17, %19 : vector<3x256xf32>
    %21 = math.tanh %20 : vector<3x256xf32>
    %c0_17 = arith.constant 0 : index
    %c0_18 = arith.constant 0 : index
    %c0_19 = arith.constant 0 : index
    %22 = vector.load %arg8[%c0_17, %c0_18, %c0_19] : memref<1x3x256xf32, #tpu.memory_space<vmem>>, vector<1x3x256xf32>
    %23 = vector.shape_cast %22 : vector<1x3x256xf32> to vector<3x256xf32>
    %24 = vector.shape_cast %21 : vector<3x256xf32> to vector<1x3x256xf32>
    tpu.vector_store %arg8[%c0_17, %c0_18, %c0_19], %24 {strides = array<i32>} : memref<1x3x256xf32, #tpu.memory_space<vmem>>, vector<1x3x256xf32>,
    return
  }
  func.func @transform_0(%arg0: i32, %arg1: i32) -> (i32, i32, i32) {
    %c0_i32 = arith.constant 0 : i32
    %c0_i32_0 = arith.constant 0 : i32
    return %arg1, %c0_i32, %arg0 : i32, i32, i32
  }
  func.func @transform_1(%arg0: i32, %arg1: i32) -> (i32, i32) {
    %c0_i32 = arith.constant 0 : i32
    %c0_i32_0 = arith.constant 0 : i32
    return %c0_i32, %arg0 : i32, i32
  }
  func.func @transform_2(%arg0: i32, %arg1: i32) -> (i32, i32) {
    %c0_i32 = arith.constant 0 : i32
    %c0_i32_0 = arith.constant 0 : i32
    %c0_i32_1 = arith.constant 0 : i32
    return %c0_i32, %c0_i32_0 : i32, i32
  }
  func.func @transform_3(%arg0: i32, %arg1: i32) -> (i32, i32) {
    %c0_i32 = arith.constant 0 : i32
    %c0_i32_0 = arith.constant 0 : i32
    %c0_i32_1 = arith.constant 0 : i32
    return %c0_i32, %c0_i32_0 : i32, i32
  }
  func.func @transform_4(%arg0: i32, %arg1: i32) -> (i32, i32) {
    %c0_i32 = arith.constant 0 : i32
    %c0_i32_0 = arith.constant 0 : i32
    %c0_i32_1 = arith.constant 0 : i32
    return %c0_i32, %c0_i32_0 : i32, i32
  }
  func.func @transform_5(%arg0: i32, %arg1: i32) -> (i32, i32) {
    %c0_i32 = arith.constant 0 : i32
    %c0_i32_0 = arith.constant 0 : i32
    %c0_i32_1 = arith.constant 0 : i32
    return %c0_i32, %c0_i32_0 : i32, i32
  }
  func.func @transform_6(%arg0: i32, %arg1: i32) -> (i32, i32, i32) {
    %c0_i32 = arith.constant 0 : i32
    %c0_i32_0 = arith.constant 0 : i32
    return %arg1, %c0_i32, %arg0 : i32, i32, i32
  }
}

</mosaic_0001>

<bundles_post_ra>
// kernel: tpu_custom_call.1
= control target key start
LH: loop header
LB: loop body
LE: loop exit
PB: predicated region body
PF: predicated region fallthrough
CT: control target
= control target key end

     0   :  { %s1652_s0 = inlined_call_operand.hbm [shape: bf16[2,4,256], index: 0, kind: input, shape index: {}]   ;;  %s1653_s1 = inlined_call_operand.hbm [shape: bf16[9,256], index: 1, kind: input, shape index: {}]   ;;  %s1654_s2 = inlined_call_operand.hbm [shape: bf16[32,4], index: 2, kind: input, shape index: {}]   ;;  %s1655_s3 = inlined_call_operand.hbm [shape: bf16[32,9], index: 3, kind: input, shape index: {}]   ;;  %s1656_s4 = inlined_call_operand.hbm [shape: f32[3,32], index: 4, kind: input, shape index: {}]   ;;  %s1657_s5 = inlined_call_operand.hbm [shape: f32[3,1], index: 5, kind: input, shape index: {}]   ;;  %s1658_s6 = inlined_call_operand.hbm [shape: f32[2,3,256], index: 6, kind: output, shape index: {}]  }
   0x1   :  { %1665 = sst [smem:[#allocation19_spill]] %s1658_s6 }
   0x2   :  { %11 = vsyncpa [#allocation3], 0 }
   0x3   :  { %13 = vsyncpa [#allocation3 + $0x1], 0 }
   0x4   :  { %14 = vsyncpa [#allocation6], 0 }
   0x5   :  { %15 = vsyncpa [#allocation9], 0 }
   0x6   :  { %16 = vsyncpa [#allocation12], 0 }
   0x7   :  { %17 = vsyncpa [#allocation4], 0 }
   0x8   :  { %19 = vsyncpa [#allocation4 + $0x1], 0  ;;  %s1351_s21 = smov 0   ;;  %s1353_s22 = smov 0  }
   0x9   :  { %s1355_s23 = smov 0   ;;  %s1357_s24 = smov 0  }
   0xa   :  { %s1359_s25 = smov 0   ;;  %s1361_s26 = smov 0  }
   0xb LB: > { %s1662_s27 = sadd.s32 4294967295, %s1300_s26   ;;  %p834_p0 = scmp.ge.s32.totalorder %s1300_s26, 1  ;;  %s1300_s26 = sphi %s1361_s26, %s25_s26   ;;  %s1296_s25 = sphi %s1359_s25, %s1687_s25   ;;  %s1292_s24 = sphi %s1357_s24, %s1686_s24   ;;  %s1288_s23 = sphi %s1355_s23, %s1685_s23   ;;  %s1284_s22 = sphi %s1353_s22, %s1684_s22   ;;  %s1280_s21 = sphi %s1351_s21, %s1683_s21  }
   0xc   : > { %p1385_p1 = scmp.eq.s32.totalorder %s1662_s27, 0  ;;  %p208_p2 = scmp.lt.s32.totalorder %s1300_s26, 3 }
   0xd   : > { %s1302_s30 = smov [#allocation5]   ;;  %s1303_s9 = smov [#allocation8]  }
   0xe   : > { %s1666_s28 = scalar_select %p1385_p1, 1, 0 }
   0xf   : > { %p1390_p3 = pnand %p834_p0, %p208_p2  ;;  %s223_s7 = sshll.u32 %s1302_s30, 4  ;;  %s224_s7 = int_to_ptr.vmem [resolvable:$true] %s223_s7 }
  0x10   : > { %s249_s10 = sshll.u32 %s1303_s9, 4  ;;  %s1036_s13 = scalar_lea.hbm %s1653_s1, 256  ;;  %s250_s10 = int_to_ptr.vmem [resolvable:$true] %s249_s10 }
  0x11   : > { %s1667_s29 = scalar_select %p1390_p3, 1, 0 }
  0x12   : > { %p912_p4 = pneg %p1390_p3  ;;  %p1037_p7 = scmp.ne.s32.totalorder %s1653_s1, %s1036_s13 }
  0x13   : > { %p1043_p11 = scmp.lt.u32.totalorder %s1036_s13, %s1653_s1 }
  0x14   : > { %p1399_p6 = pnand %p912_p4, %p1385_p1 }
  0x16   : > { %p1411_p8 = pneg %p1399_p6 }
  0x18   : > { %p1039_p9 = pnand %p1411_p8, %p1037_p7 }
  0x1a   : > { %p1040_p10 = pneg %p1039_p9 }
  0x1c   : > { %p1045_p12 = pnand %p1043_p11, %p1040_p10 }
  0x1e   : > { %1048 = shalt.err (!%p1045_p12)
}
  0x1f   : > { %s1049_s19 = scalar_lea.vmem %s224_s7, 256  ;;  %p1057_p4 = scmp.lt.s32.totalorder %s224_s7, %s224_s7 }
  0x20   : > { %p1050_p13 = scmp.ne.s32.totalorder %s224_s7, %s1049_s19  ;;  %p1058_p5 = scmp.lt.s32.totalorder %s1049_s19, %s1049_s19 }
  0x22   : > { %p1052_p0 = pnand %p1050_p13, %p1411_p8  ;;  %p1059_p3 = por %p1058_p5, %p1057_p4 }
  0x24   : > { %p1053_p2 = pneg %p1052_p0 }
  0x26   : > { %p1060_p1 = pnand %p1059_p3, %p1053_p2 }
  0x28   : > { %1063 = shalt.err (!%p1060_p1)
}
  0x29   : > { %s1304_s20 = smov 128   ;;  %s1305_s30 = smov 8  }
  0x2a   : > { %915 = dma.hbm_to_vmem [thread:$0]  (!%p1399_p6), %s1653_s1, 256, %s224_s7, [#allocation6], %s1304_s20, %s1304_s20, %s1305_s30  }
  0x2b   : > { %s1306_s12 = smov [#allocation7]   ;;  %s1064_s17 = scalar_lea.hbm %s1655_s3, 256 }
  0x2c   : > { %s236_s13 = sshll.u32 %s1306_s12, 4  ;;  %p1065_p1 = scmp.ne.s32.totalorder %s1655_s3, %s1064_s17  ;;  %s237_s13 = int_to_ptr.vmem [resolvable:$true] %s236_s13 }
  0x2d   : > { %p1071_p7 = scmp.lt.u32.totalorder %s1064_s17, %s1655_s3 }
  0x2e   : > { %p1067_p3 = pnand %p1065_p1, %p1411_p8 }
  0x30   : > { %p1068_p5 = pneg %p1067_p3 }
  0x32   : > { %p1073_p9 = pnand %p1071_p7, %p1068_p5 }
  0x34   : > { %1076 = shalt.err (!%p1073_p9)
}
  0x35   : > { %s1077_s7 = scalar_lea.vmem %s250_s10, 256  ;;  %p1085_p13 = scmp.lt.s32.totalorder %s250_s10, %s250_s10 }
  0x36   : > { %p1078_p10 = scmp.ne.s32.totalorder %s250_s10, %s1077_s7  ;;  %p1086_p0 = scmp.lt.s32.totalorder %s1077_s7, %s1077_s7 }
  0x38   : > { %p1080_p11 = pnand %p1078_p10, %p1411_p8  ;;  %p1087_p2 = por %p1086_p0, %p1085_p13 }
  0x3a   : > { %p1081_p12 = pneg %p1080_p11 }
  0x3c   : > { %p1088_p4 = pnand %p1087_p2, %p1081_p12 }
  0x3e   : > { %1091 = shalt.err (!%p1088_p4)
}
  0x3f   : > { %s1307_s20 = smov 64   ;;  %s1308_s30 = smov 4  }
  0x40   : > { %921 = dma.hbm_to_vmem [thread:$0]  (!%p1399_p6), %s1655_s3, 256, %s250_s10, [#allocation9], %s1307_s20, %s1307_s20, %s1308_s30  }
  0x41   : > { %s1092_s12 = scalar_lea.hbm %s1654_s2, 256 }
  0x42   : > { %p1093_p1 = scmp.ne.s32.totalorder %s1654_s2, %s1092_s12  ;;  %p1099_p7 = scmp.lt.u32.totalorder %s1092_s12, %s1654_s2 }
  0x44   : > { %p1095_p3 = pnand %p1093_p1, %p1411_p8 }
  0x46   : > { %p1096_p5 = pneg %p1095_p3 }
  0x48   : > { %p1101_p9 = pnand %p1099_p7, %p1096_p5 }
  0x4a   : > { %1104 = shalt.err (!%p1101_p9)
}
  0x4b   : > { %s1105_s19 = scalar_lea.vmem %s237_s13, 256  ;;  %p1113_p13 = scmp.lt.s32.totalorder %s237_s13, %s237_s13 }
  0x4c   : > { %p1106_p10 = scmp.ne.s32.totalorder %s237_s13, %s1105_s19  ;;  %p1114_p0 = scmp.lt.s32.totalorder %s1105_s19, %s1105_s19 }
  0x4e   : > { %p1108_p11 = pnand %p1106_p10, %p1411_p8  ;;  %p1115_p2 = por %p1114_p0, %p1113_p13 }
  0x50   : > { %p1109_p12 = pneg %p1108_p11 }
  0x52   : > { %p1116_p4 = pnand %p1115_p2, %p1109_p12 }
  0x54   : > { %1119 = shalt.err (!%p1116_p4)
}
  0x55   : > { %918 = dma.hbm_to_vmem [thread:$0]  (!%p1399_p6), %s1654_s2, 256, %s237_s13, [#allocation6], %s1307_s20, %s1307_s20, %s1308_s30  }
  0x56   : > { %s1309_s6 = smov [#allocation10]   ;;  %s1310_s9 = smov [#allocation11]  }
  0x57   : > { %s263_s27 = sshll.u32 %s1309_s6, 4  ;;  %s274_s11 = sshll.u32 %s1310_s9, 4  ;;  %s264_s27 = int_to_ptr.vmem [resolvable:$true] %s263_s27  ;;  %s275_s11 = int_to_ptr.vmem [resolvable:$true] %s274_s11 }
  0x58   : > { %s1120_s15 = scalar_lea.hbm %s1656_s4, 64 }
  0x59   : > { %p1121_p1 = scmp.ne.s32.totalorder %s1656_s4, %s1120_s15  ;;  %p1127_p7 = scmp.lt.u32.totalorder %s1120_s15, %s1656_s4 }
  0x5b   : > { %p1123_p3 = pnand %p1121_p1, %p1411_p8 }
  0x5d   : > { %p1124_p5 = pneg %p1123_p3 }
  0x5f   : > { %p1129_p9 = pnand %p1127_p7, %p1124_p5 }
  0x61   : > { %1132 = shalt.err (!%p1129_p9)
}
  0x62   : > { %s1133_s13 = scalar_lea.vmem %s264_s27, 64  ;;  %p1141_p13 = scmp.lt.s32.totalorder %s264_s27, %s264_s27 }
  0x63   : > { %p1134_p10 = scmp.ne.s32.totalorder %s264_s27, %s1133_s13  ;;  %p1142_p0 = scmp.lt.s32.totalorder %s1133_s13, %s1133_s13 }
  0x65   : > { %p1136_p11 = pnand %p1134_p10, %p1411_p8  ;;  %p1143_p2 = por %p1142_p0, %p1141_p13 }
  0x67   : > { %p1137_p12 = pneg %p1136_p11 }
  0x69   : > { %p1144_p4 = pnand %p1143_p2, %p1137_p12 }
  0x6b   : > { %1147 = shalt.err (!%p1144_p4)
}
  0x6c   : > { %924 = dma.hbm_to_vmem [thread:$0]  (!%p1399_p6), %s1656_s4, 64, %s264_s27, [#allocation9]  }
  0x6d   : > { %s1148_s9 = scalar_lea.hbm %s1657_s5, 64 }
  0x6e   : > { %p1149_p1 = scmp.ne.s32.totalorder %s1657_s5, %s1148_s9  ;;  %p1155_p7 = scmp.lt.u32.totalorder %s1148_s9, %s1657_s5 }
  0x70   : > { %p1151_p3 = pnand %p1149_p1, %p1411_p8 }
  0x72   : > { %p1152_p5 = pneg %p1151_p3 }
  0x74   : > { %p1157_p9 = pnand %p1155_p7, %p1152_p5 }
  0x76   : > { %1160 = shalt.err (!%p1157_p9)
}
  0x77   : > { %s1161_s18 = scalar_lea.vmem %s275_s11, 64  ;;  %p1169_p13 = scmp.lt.s32.totalorder %s275_s11, %s275_s11 }
  0x78   : > { %p1162_p10 = scmp.ne.s32.totalorder %s275_s11, %s1161_s18  ;;  %p1170_p0 = scmp.lt.s32.totalorder %s1161_s18, %s1161_s18 }
  0x7a   : > { %p1164_p11 = pnand %p1162_p10, %p1411_p8  ;;  %p1171_p2 = por %p1170_p0, %p1169_p13 }
  0x7c   : > { %p1165_p12 = pneg %p1164_p11 }
  0x7e   : > { %p1172_p4 = pnand %p1171_p2, %p1165_p12 }
  0x80   : > { %1175 = shalt.err (!%p1172_p4)
}
  0x81   : > { %927 = dma.hbm_to_vmem [thread:$0]  (!%p1399_p6), %s1657_s5, 64, %s275_s11, [#allocation12]  }
  0x82   : > { %s833_s16 = sadd.s32 4294967294, %s1300_s26   ;;  %s34_s10 = sadd.s32 1, %s1296_s25 }
  0x83   : > { %s46_s8 = sadd.s32 1, %s1288_s23  ;;  %p35_p8 = scmp.ge.s32.totalorder %s34_s10, 2 }
  0x84   : > { %p53_p1 = scmp.ne.s32.totalorder %s1288_s23, %s1284_s22  ;;  %p54_p3 = scmp.eq.s32.totalorder %s1300_s26, 0 }
  0x85   : > { %p59_p5 = scmp.ne.s32.totalorder %s1284_s22, %s1280_s21  ;;  %s1689_s10 = smov (%p35_p8, %s34_s10), 0 }
  0x86   : > { %p1509_p7 = por %p54_p3, %p53_p1  ;;  %p1671_p9 = scmp.ne.s32.totalorder %s1666_s28, 0 }
  0x87   : > { %s41_s20 = ssub.s32 %s1296_s25, %s1689_s10  ;;  %s1673_s30 = sadd.s32 4294967295, %s1300_s26  }
  0x88   : > { %p1515_p6 = por %p1671_p9, %p59_p5  ;;  %p195_p10 = scmp.eq.s32.totalorder %s1673_s30, 1 }
  0x89   : > { %p44_p11 = scmp.eq.s32.totalorder %s41_s20, 0  ;;  %p201_p12 = scmp.eq.s32.totalorder %s833_s16, 1 }
  0x8a   : > { %p1523_p13 = por %p195_p10, %p53_p1  ;;  %p941_p0 = scmp.lt.s32.totalorder %s1300_s26, 2 }
  0x8b   : > { %s1529_s6 = scalar_select %p44_p11, %s1288_s23, %s46_s8  }
  0x8c   : > { %s1674_s7 = scalar_select %p1523_p13, 1, 0 }
  0x8d   : > { %p1531_p2 = por %p201_p12, %p59_p5  ;;  %s285_s12 = sand.u32 1, %s1288_s23  }
  0x8e   : > { %s841_s14 = sshll.u32 %s285_s12, 2  ;;  %s870_s15 = sshll.u32 %s1296_s25, 6 }
  0x8f   : > { %s1675_s9 = scalar_select %p1531_p2, 1, 0 }
  0x90   : > { %s1540_s27 = scalar_lea.hbm %s1652_s0, %s870_s15  ;;  %s289_s19 = scalar_lea.vmem [#allocation2], %s841_s14 }
  0x91   : > { %s299_s16 = sshll.u32 %s289_s19, 4  ;;  %p1546_p4 = pnand %p941_p0, %p1509_p7  ;;  %s1542_s16 = int_to_ptr.vmem [resolvable:$true] %s299_s16 }
  0x92   : > { %s286_s20 = scalar_lea.sflag [#allocation3], %s285_s12  ;;  %s1176_s30 = scalar_lea.hbm %s1540_s27, 64 }
  0x93   : > { %p1177_p8 = scmp.ne.s32.totalorder %s1540_s27, %s1176_s30  ;;  %p1178_p1 = pneg %p1546_p4 }
  0x94   : > { %s1181_s17 = scalar_lea.hbm %s1652_s0, 128  ;;  %p1182_p7 = scmp.lt.u32.totalorder %s1540_s27, %s1652_s0 }
  0x95   : > { %p1179_p3 = pnand %p1178_p1, %p1177_p8  ;;  %p1183_p9 = scmp.lt.u32.totalorder %s1181_s17, %s1176_s30 }
  0x96   : > { %p1185_p11 = scmp.lt.u32.totalorder %s1176_s30, %s1540_s27 }
  0x97   : > { %p1180_p5 = pneg %p1179_p3  ;;  %p1184_p10 = por %p1183_p9, %p1182_p7 }
  0x99   : > { %p1186_p12 = por %p1185_p11, %p1184_p10 }
  0x9b   : > { %p1187_p0 = pnand %p1186_p12, %p1180_p5 }
  0x9d   : > { %1190 = shalt.err (!%p1187_p0)
}
  0x9e   : > { %s1191_s12 = scalar_lea.vmem %s1542_s16, 64  ;;  %s1311_s19 = smov [#allocation2]  }
  0x9f   : > { %p1192_p8 = scmp.ne.s32.totalorder %s1542_s16, %s1191_s12  ;;  %s1196_s14 = sshll.u32 %s1311_s19, 4  ;;  %s1197_s14 = int_to_ptr.vmem [resolvable:$false] %s1196_s14 }
  0xa0   : > { %s1198_s15 = scalar_lea.vmem %s1197_s14, 128  ;;  %p1199_p13 = scmp.lt.s32.totalorder %s1542_s16, %s1197_s14 }
  0xa1   : > { %p1194_p3 = pnand %p1192_p8, %p1178_p1  ;;  %p1200_p7 = scmp.lt.s32.totalorder %s1198_s15, %s1191_s12 }
  0xa3   : > { %p1195_p2 = pneg %p1194_p3  ;;  %p1201_p9 = por %p1200_p7, %p1199_p13 }
  0xa5   : > { %p1202_p10 = pnand %p1201_p9, %p1195_p2 }
  0xa7   : > { %1205 = shalt.err (!%p1202_p10)
}
  0xa8   : > { %931 = dma.hbm_to_vmem [thread:$0]  (!%p1546_p4), %s1540_s27, 64, %s1542_s16, %s286_s20  }
  0xa9   : > { %p1677_p5 = scmp.ne.s32.totalorder %s1667_s29, 0 }
  0xaa   : > { %s1578_s30 = sand.u32 (!%p1677_p5), 1, %s1284_s22  }
  0xab   : > { %308 = sbr.rel (%p1677_p5) target bundleno = 685 (0x2ad), region = 44  ;;  %s845_s17 = sshll.u32 (!%p1677_p5), %s1578_s30, 2 }
  0xac   : > { %s311_s13 = scalar_lea.sflag (!%p1677_p5), [#allocation3], %s1578_s30  ;;  %s314_s18 = scalar_lea.vmem (!%p1677_p5), [#allocation2], %s845_s17 }
  0xb2   : > { %1259 = dma.done.wait (%p1515_p6), %s311_s13, 64  }
  0xb3   : > { %1261 = vsyncadd (%p1515_p6), %s311_s13, 4294967232  ;;  %p1678_p13 = scmp.ne.s32.totalorder %s1666_s28, 0 }
  0xb5   : > { %1263 = dma.done.wait (%p1678_p13), [#allocation6], 512  }
  0xb6   : > { %1265 = vsyncadd (%p1678_p13), [#allocation6], 4294966784 }
  0xb7   : > { %1267 = dma.done.wait (%p1678_p13), [#allocation9], 320  }
  0xb8   : > { %1269 = vsyncadd (%p1678_p13), [#allocation9], 4294966976 }
  0xb9   : > { %1271 = dma.done.wait (%p1678_p13), [#allocation12], 64  }
  0xba   : > { %1273 = vsyncadd (%p1678_p13), [#allocation12], 4294967232  ;;  %vm403_vm0 = vcmask 1043456   ;;  %v1312_v0 = vmov 0   ;;  %vm404_vm1 = vcmask 1044480   ;;  %v1313_v1 = vmov 65535  }
  0xbb   : > { %531 = vmatprep.mubr.bf16.mxu0 %v1312_v0  ;;  %445 = vmatprep.mubr.bf16.mxu1 %v1312_v0  ;;  %v405_v2 = vsel %vm403_vm0, 4294967295, %v1313_v1  ;;  %vm492_vm2 = vcmask 1041408   ;;  %v860_v3 = vld.sshfl [vmem:[%s314_s18] sm:$0x33 pattern:$0x76325410] }
  0xbc   : > { %1008 = vset.pattern.permute.xlu0 %v1312_v0  ;;  %v406_v4 = vsel %vm404_vm1, %v405_v2, 0  ;;  %v484_v5 = vcombine.high %v860_v3, %v860_v3  ;;  %v494_v6 = vsel %vm492_vm2, %v860_v3, 0  ;;  %v1009_v7 = vld [vmem:[#allocation5 + $0x4] ss:$8 sps:$4 sm:$0x1f]   ;;  %v1012_v9 = vld [vmem:[#allocation7] sm:$0xff]  }
  0xbd   : > { %v1011_v8 = vld [vmem:[#allocation5] ss:$8 sps:$4 sm:$0x1f]   ;;  %v411_v10 = vand.u32 %v1009_v7, %v406_v4  ;;  %vm485_vm3 = vcmask 31744   ;;  %vm396_vm4 = vcmask 72704   ;;  %v1014_v13 = vld [vmem:[#allocation7 + $0x8] sm:$0xff]  }
  0xbe   : > { %861 = vmatprep.subr.msk.bf16.mxu0 %vm492_vm2, %v484_v5  ;;  %v408_v11 = vand.u32 %v1011_v8, %v406_v4  ;;  %v1013_v12 = vld [vmem:[#allocation8] sm:$0xff]   ;;  %v1015_v14 = vld [vmem:[#allocation8 + $0x8] sm:$0xff]   ;;  %v1314_v15 = vmov 0.0   ;;  %v593_v16 = vld [vmem:[#allocation11] sm:$0x7]  ;;  %vm599_vm5 = vcmask 261120  }
  0xbf   : > { %500 = vmatpush1.bf16.msra.mxu0 %v494_v6  ;;  %413 = vmatprep.subr.bf16.mxu1 %v411_v10  ;;  %s851_s28 = sshll.u32 %s1578_s30, 3  ;;  %s871_s29 = sshll.u32 %s1292_s24, 7 }
  0xc0   : > { %414 = vmatpush1.bf16.msra.mxu1 %v408_v11  ;;  %596 = vperm.xlu0 %1008, %v593_v16   ;;  %s362_s11 = scalar_lea.vmem [#allocation13], %s851_s28  ;;  %s1679_s20 = sld [smem:[#allocation19_spill]] }
  0xc1   : > { %s698_s27 = sshll.u32 %s362_s11, 4  ;;  %s682_s19 = scalar_lea.sflag [#allocation4], %s1578_s30  ;;  %s1605_s27 = int_to_ptr.vmem [resolvable:$true] %s698_s27 }
  0xc2   : > { %862 = vmatmul.mubr.msk.bf16.vlgmr.msra.gmra.mrb[0].mxu0 %vm485_vm3, %v1012_v9  ;;  %s1206_s14 = scalar_lea.vmem %s1605_s27, 128  ;;  %p1680_p2 = scmp.ne.s32.totalorder %s1674_s7, 0 }
  0xc3   : > { %541 = vmatprep.mubr.bf16.mxu0 %v1312_v0  ;;  %856 = vmatmul.mubr.msk.bf16.vlgmr.msra.gmra.mrb[0].mxu1 %vm396_vm4, %v1013_v12  ;;  %p1207_p6 = scmp.ne.s32.totalorder %s1605_s27, %s1206_s14  ;;  %s1315_s24 = smov [#allocation13]  }
  0xc4   : > { %455 = vmatprep.mubr.bf16.mxu1 %v1312_v0  ;;  %s1210_s15 = sshll.u32 %s1315_s24, 4  ;;  %s1211_s15 = int_to_ptr.vmem [resolvable:$false] %s1210_s15 }
  0xc5   : > { %p1208_p4 = pnand %p1207_p6, %p1680_p2  ;;  %s1212_s17 = scalar_lea.vmem %s1211_s15, 256 }
  0xc6   : > { %s1603_s12 = scalar_lea.hbm %s1679_s20, %s871_s29  ;;  %p1213_p11 = scmp.lt.s32.totalorder %s1605_s27, %s1211_s15 }
  0xc7   : > { %p1209_p1 = pneg %p1208_p4  ;;  %p1214_p12 = scmp.lt.s32.totalorder %s1212_s17, %s1206_s14 }
  0xc9   : > { %p1215_p0 = por %p1214_p12, %p1213_p11 }
  0xca   : > { %863 = vmatmul.mubr.msk.bf16.gmra.mrb[4].mxu0 %vm485_vm3, %v1014_v13 }
  0xcb   : > { %857 = vmatmul.mubr.msk.bf16.gmra.mrb[4].mxu1 %vm396_vm4, %v1015_v14  ;;  %p1216_p8 = pnand %p1215_p0, %p1209_p1 }
  0xcc   : > { %667 = vmatprep.mubr.f32.mxu1 %v1314_v15 }
 0x195   : > { %v533_v17 = vpop.f32.mrb[0].mxu0 }
 0x196   : > { %v535_v18 = vpop.f32.mrb[1].mxu0  ;;  %v447_v19 = vpop.f32.mrb[0].mxu1 }
 0x197   : > { %v537_v20 = vpop.f32.mrb[2].mxu0  ;;  %v534_v21 = vadd.f32 %v533_v17, %v447_v19  ;;  %v449_v22 = vpop.f32.mrb[1].mxu1 }
 0x198   : > { %v539_v23 = vpop.f32.mrb[3].mxu0  ;;  %v536_v24 = vadd.f32 %v535_v18, %v449_v22  ;;  %v451_v25 = vpop.f32.mrb[2].mxu1 }
 0x199   : > { %v552_v26 = vmul.f32 0.70710677, %v534_v21  ;;  %v538_v27 = vadd.f32 %v537_v20, %v451_v25  ;;  %v453_v28 = vpop.f32.mrb[3].mxu1  ;;  %v568_v55 = vmul.f32 0.5, %v534_v21  ;;  %v592_v21 = vld [vmem:[#allocation10] sm:$0x7]  ;;  %v597_v22 = vpop.permute.xlu0 %596 }
 0x19a   : > { %v553_v29 = vmul.f32 0.70710677, %v536_v24  ;;  %v540_v30 = vadd.f32 %v539_v23, %v453_v28  ;;  %v569_v58 = vmul.f32 0.5, %v536_v24 }
 0x19b   : > { %1016 = verf.f32 %v552_v26  ;;  %v554_v31 = vmul.f32 0.70710677, %v538_v27  ;;  %v570_v56 = vmul.f32 0.5, %v538_v27 }
 0x19c   : > { %1018 = verf.f32 %v553_v29  ;;  %v555_v32 = vmul.f32 0.70710677, %v540_v30  ;;  %v571_v59 = vmul.f32 0.5, %v540_v30 }
 0x19d   : > { %v543_v33 = vpop.f32.mrb[4].mxu0  ;;  %1020 = verf.f32 %v554_v31 }
 0x19e   : > { %v545_v34 = vpop.f32.mrb[5].mxu0  ;;  %1022 = verf.f32 %v555_v32  ;;  %v457_v35 = vpop.f32.mrb[4].mxu1 }
 0x19f   : > { %v547_v36 = vpop.f32.mrb[6].mxu0  ;;  %v544_v37 = vadd.f32 %v543_v33, %v457_v35  ;;  %v459_v38 = vpop.f32.mrb[5].mxu1 }
 0x1a0   : > { %v549_v39 = vpop.f32.mrb[7].mxu0  ;;  %v546_v40 = vadd.f32 %v545_v34, %v459_v38  ;;  %v461_v41 = vpop.f32.mrb[6].mxu1 }
 0x1a1   : > { %v556_v42 = vmul.f32 0.70710677, %v544_v37  ;;  %v548_v43 = vadd.f32 %v547_v36, %v461_v41  ;;  %v463_v44 = vpop.f32.mrb[7].mxu1  ;;  %v572_v9 = vmul.f32 0.5, %v544_v37 }
 0x1a2   : > { %v557_v45 = vmul.f32 0.70710677, %v546_v40  ;;  %v550_v46 = vadd.f32 %v549_v39, %v463_v44  ;;  %v573_v12 = vmul.f32 0.5, %v546_v40 }
 0x1a3   : > { %1024 = verf.f32 %v556_v42  ;;  %v558_v47 = vmul.f32 0.70710677, %v548_v43  ;;  %v574_v10 = vmul.f32 0.5, %v548_v43 }
 0x1a4   : > { %1026 = verf.f32 %v557_v45  ;;  %v559_v48 = vmul.f32 0.70710677, %v550_v46  ;;  %v575_v13 = vmul.f32 0.5, %v550_v46 }
 0x1a5   : > { %v1017_v49 = vpop.eup %1016  ;;  %1028 = verf.f32 %v558_v47 }
 0x1a6   : > { %v1019_v50 = vpop.eup %1018  ;;  %v576_v51 = vadd.f32 1.0, %v1017_v49  ;;  %1030 = verf.f32 %v559_v48 }
 0x1a7   : > { %v1021_v52 = vpop.eup %1020  ;;  %v577_v53 = vadd.f32 1.0, %v1019_v50 }
 0x1a8   : > { %v1023_v54 = vpop.eup %1022  ;;  %v578_v57 = vadd.f32 1.0, %v1021_v52  ;;  %v584_v61 = vmul.f32 %v576_v51, %v568_v55 }
 0x1a9   : > { %v579_v60 = vadd.f32 1.0, %v1023_v54  ;;  %v585_v63 = vmul.f32 %v577_v53, %v569_v58 }
 0x1aa   : > { %v586_v62 = vmul.f32 %v578_v57, %v570_v56 }
 0x1ab   : > { %v587_v0 = vmul.f32 %v579_v60, %v571_v59 }
 0x1ac   : > { %v874_v1 = vpack.c.bf16 %v586_v62, %v584_v61 }
 0x1ad   : > { %v1025_v2 = vpop.eup %1024  ;;  %v872_v3 = vpack.c.bf16 %v587_v0, %v585_v63 }
 0x1ae   : > { %v1027_v4 = vpop.eup %1026  ;;  %v580_v5 = vadd.f32 1.0, %v1025_v2 }
 0x1af   : > { %v1029_v6 = vpop.eup %1028  ;;  %v581_v7 = vadd.f32 1.0, %v1027_v4  ;;  %873 = vmatprep.subr.bf16.mxu1 %v872_v3 }
 0x1b0   : > { %v1031_v8 = vpop.eup %1030  ;;  %v582_v11 = vadd.f32 1.0, %v1029_v6  ;;  %875 = vmatpush1.bf16.msra.mxu1 %v874_v1  ;;  %v588_v15 = vmul.f32 %v580_v5, %v572_v9 }
 0x1b1   : > { %v583_v14 = vadd.f32 1.0, %v1031_v8  ;;  %v589_v17 = vmul.f32 %v581_v7, %v573_v12 }
 0x1b2   : > { %v590_v16 = vmul.f32 %v582_v11, %v574_v10 }
 0x1b3   : > { %v591_v18 = vmul.f32 %v583_v14, %v575_v13 }
 0x1b4   : > { %v878_v19 = vpack.c.bf16 %v590_v16, %v588_v15 }
 0x1b5   : > { %v876_v20 = vpack.c.bf16 %v591_v18, %v589_v17 }
 0x1b7   : > { %877 = vmatprep.subr.bf16.mxu1 %v876_v20 }
 0x1b8   : > { %879 = vmatpush1.bf16.msra.mxu1 %v878_v19 }
 0x1bb   : > { %864 = vmatmul.mubr.msk.f32.vlgmr.msra.gmra.mrb[8].mxu1 %vm599_vm5, %v592_v21 }
 0x28e   : > { %v669_v23 = vpop.f32.mrb[8].mxu1 }
 0x28f   : > { %v670_v24 = vadd.f32 %v669_v23, %v597_v22  ;;  %v671_v25 = vpop.f32.mrb[9].mxu1 }
 0x290   : > { %v672_v26 = vadd.f32 %v671_v25, %v597_v22 }
 0x291   : > { %1032 = vtanh.f32 %v670_v24 }
 0x292   : > { %1034 = vtanh.f32 %v672_v26 }
 0x29b   : > { %v1033_v27 = vpop.eup %1032 }
 0x29c   : > { %v1035_v28 = vpop.eup %1034 }
 0x29d   : > { %v678_v29 = vcombine.low %v1033_v27, %v1035_v28 }
 0x29f   : > { %680 = vst [vmem:[%s362_s11] sm:$0x77] %v678_v29 }
 0x2a0   : > { %1219 = shalt.err (!%p1216_p8)
}
 0x2a1   : > { %s1220_s30 = scalar_lea.hbm %s1603_s12, 128  ;;  %s1224_s28 = scalar_lea.hbm %s1679_s20, 256 }
 0x2a2   : > { %p1221_p3 = scmp.ne.s32.totalorder %s1603_s12, %s1220_s30  ;;  %p1225_p10 = scmp.lt.u32.totalorder %s1603_s12, %s1679_s20 }
 0x2a3   : > { %p1226_p5 = scmp.lt.u32.totalorder %s1224_s28, %s1220_s30  ;;  %p1228_p6 = scmp.lt.u32.totalorder %s1220_s30, %s1603_s12 }
 0x2a4   : > { %p1222_p7 = pnand %p1221_p3, %p1680_p2 }
 0x2a5   : > { %p1227_p13 = por %p1226_p5, %p1225_p10 }
 0x2a6   : > { %p1223_p9 = pneg %p1222_p7 }
 0x2a7   : > { %p1229_p4 = por %p1228_p6, %p1227_p13 }
 0x2a9   : > { %p1230_p1 = pnand %p1229_p4, %p1223_p9 }
 0x2ab   : > { %1233 = shalt.err (!%p1230_p1)
}
 0x2ac   : > { %910 = dma.vmem_to_hbm [thread:$0]  (%p1680_p2), %s1605_s27, 128, %s1603_s12, %s682_s19  }
 0x2ad PF: > { %s710_s16 = sand.u32 1, %s1280_s21   ;;  %p1681_p11 = scmp.ne.s32.totalorder %s1675_s9, 0 }
 0x2ae   : > { %p1682_p12 = scmp.ge.s32.totalorder %s1300_s26, 2  ;;  %s711_s8 = scalar_lea.sflag [#allocation4], %s710_s16 }
 0x2b0   : > { %p933_p0 = pnand %p1682_p12, %p1681_p11 }
 0x2b2   : > { %1275 = dma.done.wait (!%p933_p0), %s711_s8, 128  }
 0x2b3   : > { %1277 = vsyncadd (!%p933_p0), %s711_s8, 4294967168  ;;  %s25_s26 = sadd.s32 1, %s1300_s26   ;;  %s1683_s21 = smov %s1284_s22 }
 0x2b4   : > { %p22_p8 = scmp.ge.s32.totalorder %s25_s26, 4   ;;  %s1684_s22 = smov %s1288_s23 }
 0x2b5   : > { %s1685_s23 = smov %s1529_s6  ;;  %s1686_s24 = smov %s1296_s25 }
 0x2b6   : > { %s1687_s25 = smov %s1689_s10  ;;  %24 = sbr.rel (!%p22_p8) target bundleno = 11 (0xb), region = 110 }
 0x2bd   :  { %716 = vsyncpa [#allocation3], 1 }
 0x2be   :  { %718 = vsyncpa [#allocation3 + $0x1], 1 }
 0x2bf   :  { %719 = vsyncpa [#allocation6], 1 }
 0x2c0   :  { %720 = vsyncpa [#allocation9], 1 }
 0x2c1   :  { %721 = vsyncpa [#allocation12], 1 }
 0x2c2   :  { %722 = vsyncpa [#allocation4], 1 }
 0x2c3   :  { %724 = vsyncpa [#allocation4 + $0x1], 1 }

</bundles_post_ra>
